<compile_context>
chip_gen: v5e
topology: v5e:2x2
jax: 0.10.0
libtpu: 0.0.40
codegen_flags: <defaults>
</compile_context>

<pallas_src>
import jax
import jax.numpy as jnp
from jax.experimental import pallas as pl
from jax.experimental.pallas import tpu as pltpu

LANE = 128
SUBLANE = 8


def _round_up(x, m):
    return ((x + m - 1) // m) * m


def agent_kernel(alpha_ref, x_ref, w1_ref, b1_ref, w2_ref, b2_ref,
                 w3_ref, b3_ref, o_ref):
    # Normalize in f32 regardless of the streaming dtype.
    x = x_ref[...].astype(jnp.float32)

    # F.normalize(x, dim=1): x * rsqrt(max(sum(x^2), 1e-24)) == x / max(||x||, 1e-12)
    sq = jnp.sum(x * x, axis=1, keepdims=True)
    x = x * jax.lax.rsqrt(jnp.maximum(sq, 1e-24))

    a1 = alpha_ref[0]   # SMEM scalar (shared PReLU alpha, layer 1)
    a2 = alpha_ref[1]   # SMEM scalar (shared PReLU alpha, layer 2)

    def prelu(h, alpha):
        return jnp.where(h >= 0, h, alpha * h)

    compute_dtype = w1_ref.dtype          # f32, or bf16 when use_bf16=True
    x = x.astype(compute_dtype)

    # Layer 1: Linear(obs -> hidden) + PReLU   (f32 accumulate, f32 bias)
    h = jnp.dot(x, w1_ref[...], preferred_element_type=jnp.float32) + b1_ref[...]
    h = prelu(h, a1).astype(compute_dtype)

    # Layer 2: Linear(hidden -> hidden) + PReLU
    h = jnp.dot(h, w2_ref[...], preferred_element_type=jnp.float32) + b2_ref[...]
    h = prelu(h, a2).astype(compute_dtype)

    # Layer 3: Linear(hidden -> action) — written unpadded (tiny HBM writeback).
    out = jnp.dot(h, w3_ref[...], preferred_element_type=jnp.float32) + b3_ref[...]
    o_ref[...] = out.astype(o_ref.dtype)


def agent_reference(x, p):
    """Pure-JAX reference mirroring the PyTorch forward (also the small-B fast path)."""
    norm = jnp.sqrt(jnp.sum(x * x, axis=1, keepdims=True))
    x = x / jnp.maximum(norm, 1e-12)
    prelu = lambda h, a: jnp.where(h >= 0, h, a * h)
    h = prelu(x @ p["w1"] + p["b1"], p["a1"][0, 0])
    h = prelu(h @ p["w2"] + p["b2"], p["a2"][0, 0])
    return h @ p["w3"] + p["b3"]


def agent_forward(x, params, *, batch_tile=2048, use_bf16=False,
                  small_batch_threshold=1024, force_kernel=False):
    """x: (B, obs) float32. params: weights already transposed to (in, out)."""
    B, obs = x.shape

    # Fast path: at small B the pallas_call launch/step overhead dominates and
    # fused XLA is at least as fast.  `force_kernel` exists for testing.
    if B < small_batch_threshold and not force_kernel:
        return agent_reference(x, params)

    w1, b1, a1 = params["w1"], params["b1"], params["a1"]
    w2, b2, a2 = params["w2"], params["b2"], params["a2"]
    w3, b3 = params["w3"], params["b3"]
    hidden = w1.shape[1]
    action = w3.shape[1]

    out_dtype = jnp.float32
    if use_bf16:
        # Halves x/weight HBM bytes and hits the native bf16 MXU path.
        x = x.astype(jnp.bfloat16)
        w1 = w1.astype(jnp.bfloat16)
        w2 = w2.astype(jnp.bfloat16)
        w3 = w3.astype(jnp.bfloat16)
        # biases and output stay f32 (f32 accumulation inside the kernel)

    # ---- batch tile selection -------------------------------------------------
    # Start from batch_tile, then:
    #   (1) ensure at least 2 grid steps when B > 8 so v7x's second TensorCore
    #       gets work via dimension_semantics=("parallel",),
    #   (2) cap by a layout-aware VMEM budget (x and out blocks each occupy
    #       tb * 128 lanes * 4 B in (8,128)-tiled VMEM, double-buffered),
    #       keeping well under v7x's 64 MiB physical VMEM.
    tb = batch_tile
    tb = min(tb, max(SUBLANE, _round_up((B + 1) // 2, SUBLANE)))        # (1)
    bytes_per_row = 2 * (LANE * 4) + 2 * (LANE * 4)                      # in + out, 2x buffered
    vmem_budget = 40 * 1024 * 1024
    tb_cap = max(SUBLANE, (vmem_budget // bytes_per_row) // SUBLANE * SUBLANE)
    tb = min(tb, tb_cap)                                                 # (2)

    b_pad = _round_up(B, tb)
    if b_pad != B:
        x = jnp.pad(x, ((0, b_pad - B), (0, 0)))
    grid = (b_pad // tb,)

    # VMEM limit: streamed tiles + weights + headroom, capped v7x-safe.
    vmem_limit = int(min(48 * 1024 * 1024,
                         max(16 * 1024 * 1024, tb * bytes_per_row + 8 * 1024 * 1024)))

    # Shared PReLU scalars -> SMEM via scalar prefetch (single shared alpha each).
    alphas = jnp.concatenate(
        [a1.reshape(-1)[:1], a2.reshape(-1)[:1]]).astype(jnp.float32)

    grid_spec = pltpu.PrefetchScalarGridSpec(
        num_scalar_prefetch=1,
        grid=grid,
        in_specs=[
            pl.BlockSpec((tb, obs), lambda i, alphas: (i, 0)),         # x tile (streamed)
            pl.BlockSpec((obs, hidden), lambda i, alphas: (0, 0)),     # w1 resident
            pl.BlockSpec((1, hidden), lambda i, alphas: (0, 0)),       # b1 resident
            pl.BlockSpec((hidden, hidden), lambda i, alphas: (0, 0)),  # w2 resident
            pl.BlockSpec((1, hidden), lambda i, alphas: (0, 0)),       # b2 resident
            pl.BlockSpec((hidden, action), lambda i, alphas: (0, 0)),  # w3 resident
            pl.BlockSpec((1, action), lambda i, alphas: (0, 0)),       # b3 resident
        ],
        out_specs=pl.BlockSpec((tb, action), lambda i, alphas: (i, 0)),
    )

    out = pl.pallas_call(
        agent_kernel,
        out_shape=jax.ShapeDtypeStruct((b_pad, action), out_dtype),
        grid_spec=grid_spec,
        compiler_params=pltpu.CompilerParams(
            dimension_semantics=("parallel",),
            vmem_limit_bytes=vmem_limit,
        ),
    )(alphas, x, w1, b1, w2, b2, w3, b3)

    return out[:B]


def make_params(key, obs, hidden, action):
    """Deterministic synthetic parameter init (shapes match the nn.Module)."""
    ks = jax.random.split(key, 6)
    # PyTorch Linear weight is (out, in); store transposed (in, out) for x @ W.
    w1 = jax.random.normal(ks[0], (obs, hidden), jnp.float32) * 0.1
    b1 = jax.random.normal(ks[1], (1, hidden), jnp.float32) * 0.1
    w2 = jax.random.normal(ks[2], (hidden, hidden), jnp.float32) * 0.1
    b2 = jax.random.normal(ks[3], (1, hidden), jnp.float32) * 0.1
    w3 = jax.random.normal(ks[4], (hidden, action), jnp.float32) * 0.1
    b3 = jax.random.normal(ks[5], (1, action), jnp.float32) * 0.1
    # nn.PReLU() default: single shared parameter initialized to 0.25
    a1 = jnp.full((1, 1), 0.25, jnp.float32)
    a2 = jnp.full((1, 1), 0.25, jnp.float32)
    return dict(w1=w1, b1=b1, a1=a1, w2=w2, b2=b2, a2=a2, w3=w3, b3=b3)


if __name__ == "__main__":
    OBS, HIDDEN, ACTION = 16, 32, 4

    key = jax.random.PRNGKey(0)
    kx_small, kx_med, kp = jax.random.split(key, 3)
    params = make_params(kp, OBS, HIDDEN, ACTION)

    # 1) Tiny batch through the forced kernel path (grid = 1).
    x_small = jax.random.normal(kx_small, (8, OBS), jnp.float32)
    out_small = jax.block_until_ready(
        agent_forward(x_small, params, force_kernel=True))
    ref_small = agent_reference(x_small, params)
    assert out_small.shape == (8, ACTION)
    assert jnp.allclose(out_small, ref_small, atol=1e-5, rtol=1e-5), \
        "kernel (B=8) mismatch vs reference"

    # 2) Same batch through the small-B fast path (pure JAX).
    out_fast = jax.block_until_ready(agent_forward(x_small, params))
    assert jnp.allclose(out_fast, ref_small, atol=1e-5, rtol=1e-5), \
        "fast path mismatch vs reference"

    # 3) Medium batch through the kernel with a multi-step grid (grid >= 2),
    #    exercising the resident-weight pipeline and the megacore split.
    x_med = jax.random.normal(kx_med, (256, OBS), jnp.float32)
    out_med = jax.block_until_ready(
        agent_forward(x_med, params, force_kernel=True))
    ref_med = agent_reference(x_med, params)
    assert out_med.shape == (256, ACTION)
    assert jnp.allclose(out_med, ref_med, atol=1e-5, rtol=1e-5), \
        "kernel (B=256) mismatch vs reference"

    print("KERNEL_OK")
</pallas_src>

<mosaic_0001>
module attributes {stable_mosaic.version = 11 : i64} {
  func.func @agent_kernel(%arg0: i32, %arg1: memref<2xf32, #tpu.memory_space<smem>>, %arg2: memref<8x16xf32, #tpu.memory_space<vmem>>, %arg3: memref<16x32xf32, #tpu.memory_space<vmem>>, %arg4: memref<1x32xf32, #tpu.memory_space<vmem>>, %arg5: memref<32x32xf32, #tpu.memory_space<vmem>>, %arg6: memref<1x32xf32, #tpu.memory_space<vmem>>, %arg7: memref<32x4xf32, #tpu.memory_space<vmem>>, %arg8: memref<1x4xf32, #tpu.memory_space<vmem>>, %arg9: memref<8x4xf32, #tpu.memory_space<vmem>>) attributes {dimension_semantics = [#tpu.dimension_semantics<parallel>], iteration_bounds = array<i64: 1>, scalar_prefetch = 1 : i64, scratch_operands = 0 : i64, tpu.core_type = #tpu.core_type<tc>, window_params = [{transform_indices = @transform_0, window_bounds = array<i64: 8, 16>}, {pipeline_mode = #tpu.pipeline_mode<synchronous>, transform_indices = @transform_1, window_bounds = array<i64: 16, 32>}, {pipeline_mode = #tpu.pipeline_mode<synchronous>, transform_indices = @transform_2, window_bounds = array<i64: 1, 32>}, {pipeline_mode = #tpu.pipeline_mode<synchronous>, transform_indices = @transform_3, window_bounds = array<i64: 32, 32>}, {pipeline_mode = #tpu.pipeline_mode<synchronous>, transform_indices = @transform_4, window_bounds = array<i64: 1, 32>}, {pipeline_mode = #tpu.pipeline_mode<synchronous>, transform_indices = @transform_5, window_bounds = array<i64: 32, 4>}, {pipeline_mode = #tpu.pipeline_mode<synchronous>, transform_indices = @transform_6, window_bounds = array<i64: 1, 4>}, {transform_indices = @transform_7, window_bounds = array<i64: 8, 4>}]} {
    %c0 = arith.constant 0 : index
    %c0_0 = arith.constant 0 : index
    %0 = vector.load %arg2[%c0, %c0_0] : memref<8x16xf32, #tpu.memory_space<vmem>>, vector<8x16xf32>
    %1 = arith.mulf %0, %0 : vector<8x16xf32>
    %cst = arith.constant dense<0.000000e+00> : vector<8xf32>
    %2 = vector.multi_reduction <add>, %1, %cst [1] : vector<8x16xf32> to vector<8xf32>
    %3 = vector.shape_cast %2 : vector<8xf32> to vector<8x1xf32>
    %cst_1 = arith.constant 1.000000e-24 : f32
    %4 = vector.broadcast %cst_1 : f32 to vector<8x1xf32>
    %5 = arith.maximumf %3, %4 : vector<8x1xf32>
    %6 = math.rsqrt %5 : vector<8x1xf32>
    %7 = vector.broadcast %6 : vector<8x1xf32> to vector<8x16xf32>
    %8 = arith.mulf %0, %7 : vector<8x16xf32>
    %c0_2 = arith.constant 0 : index
    %9 = memref.load %arg1[%c0_2] : memref<2xf32, #tpu.memory_space<smem>>
    %c1 = arith.constant 1 : index
    %10 = memref.load %arg1[%c1] : memref<2xf32, #tpu.memory_space<smem>>
    %c0_3 = arith.constant 0 : index
    %c0_4 = arith.constant 0 : index
    %11 = vector.load %arg3[%c0_3, %c0_4] : memref<16x32xf32, #tpu.memory_space<vmem>>, vector<16x32xf32>
    %cst_5 = arith.constant dense<0.000000e+00> : vector<8x32xf32>
    %12 = tpu.matmul %8, %11, %cst_5 {dimension_numbers = #tpu.dot_dimension_numbers<[1], [0], [0], [1], [0, 0, 1, 1], [], []>} : vector<8x16xf32>, vector<16x32xf32>, vector<8x32xf32> -> vector<8x32xf32>
    %c0_6 = arith.constant 0 : index
    %c0_7 = arith.constant 0 : index
    %13 = vector.load %arg4[%c0_6, %c0_7] : memref<1x32xf32, #tpu.memory_space<vmem>>, vector<1x32xf32>
    %14 = vector.broadcast %13 : vector<1x32xf32> to vector<8x32xf32>
    %15 = arith.addf %12, %14 : vector<8x32xf32>
    %cst_8 = arith.constant 0.000000e+00 : f32
    %16 = vector.broadcast %cst_8 : f32 to vector<8x32xf32>
    %17 = arith.cmpf oge, %15, %16 : vector<8x32xf32>
    %18 = vector.broadcast %9 : f32 to vector<8x32xf32>
    %19 = arith.mulf %18, %15 : vector<8x32xf32>
    %20 = arith.select %17, %15, %19 : vector<8x32xi1>, vector<8x32xf32>
    %c0_9 = arith.constant 0 : index
    %c0_10 = arith.constant 0 : index
    %21 = vector.load %arg5[%c0_9, %c0_10] : memref<32x32xf32, #tpu.memory_space<vmem>>, vector<32x32xf32>
    %cst_11 = arith.constant dense<0.000000e+00> : vector<8x32xf32>
    %22 = tpu.matmul %20, %21, %cst_11 {dimension_numbers = #tpu.dot_dimension_numbers<[1], [0], [0], [1], [0, 0, 1, 1], [], []>} : vector<8x32xf32>, vector<32x32xf32>, vector<8x32xf32> -> vector<8x32xf32>
    %c0_12 = arith.constant 0 : index
    %c0_13 = arith.constant 0 : index
    %23 = vector.load %arg6[%c0_12, %c0_13] : memref<1x32xf32, #tpu.memory_space<vmem>>, vector<1x32xf32>
    %24 = vector.broadcast %23 : vector<1x32xf32> to vector<8x32xf32>
    %25 = arith.addf %22, %24 : vector<8x32xf32>
    %cst_14 = arith.constant 0.000000e+00 : f32
    %26 = vector.broadcast %cst_14 : f32 to vector<8x32xf32>
    %27 = arith.cmpf oge, %25, %26 : vector<8x32xf32>
    %28 = vector.broadcast %10 : f32 to vector<8x32xf32>
    %29 = arith.mulf %28, %25 : vector<8x32xf32>
    %30 = arith.select %27, %25, %29 : vector<8x32xi1>, vector<8x32xf32>
    %c0_15 = arith.constant 0 : index
    %c0_16 = arith.constant 0 : index
    %31 = vector.load %arg7[%c0_15, %c0_16] : memref<32x4xf32, #tpu.memory_space<vmem>>, vector<32x4xf32>
    %cst_17 = arith.constant dense<0.000000e+00> : vector<8x4xf32>
    %32 = tpu.matmul %30, %31, %cst_17 {dimension_numbers = #tpu.dot_dimension_numbers<[1], [0], [0], [1], [0, 0, 1, 1], [], []>} : vector<8x32xf32>, vector<32x4xf32>, vector<8x4xf32> -> vector<8x4xf32>
    %c0_18 = arith.constant 0 : index
    %c0_19 = arith.constant 0 : index
    %33 = vector.load %arg8[%c0_18, %c0_19] : memref<1x4xf32, #tpu.memory_space<vmem>>, vector<1x4xf32>
    %34 = vector.broadcast %33 : vector<1x4xf32> to vector<8x4xf32>
    %35 = arith.addf %32, %34 : vector<8x4xf32>
    %c0_20 = arith.constant 0 : index
    %c0_21 = arith.constant 0 : index
    %36 = vector.load %arg9[%c0_20, %c0_21] : memref<8x4xf32, #tpu.memory_space<vmem>>, vector<8x4xf32>
    tpu.vector_store %arg9[%c0_20, %c0_21], %35 {strides = array<i32>} : memref<8x4xf32, #tpu.memory_space<vmem>>, vector<8x4xf32>,
    return
  }
  func.func @transform_0(%arg0: i32, %arg1: memref<2xf32, #tpu.memory_space<smem>>) -> (i32, i32) {
    %c0_i32 = arith.constant 0 : i32
    %c0_i32_0 = arith.constant 0 : i32
    return %arg0, %c0_i32 : i32, i32
  }
  func.func @transform_1(%arg0: i32, %arg1: memref<2xf32, #tpu.memory_space<smem>>) -> (i32, i32) {
    %c0_i32 = arith.constant 0 : i32
    %c0_i32_0 = arith.constant 0 : i32
    %c0_i32_1 = arith.constant 0 : i32
    return %c0_i32, %c0_i32_0 : i32, i32
  }
  func.func @transform_2(%arg0: i32, %arg1: memref<2xf32, #tpu.memory_space<smem>>) -> (i32, i32) {
    %c0_i32 = arith.constant 0 : i32
    %c0_i32_0 = arith.constant 0 : i32
    %c0_i32_1 = arith.constant 0 : i32
    return %c0_i32, %c0_i32_0 : i32, i32
  }
  func.func @transform_3(%arg0: i32, %arg1: memref<2xf32, #tpu.memory_space<smem>>) -> (i32, i32) {
    %c0_i32 = arith.constant 0 : i32
    %c0_i32_0 = arith.constant 0 : i32
    %c0_i32_1 = arith.constant 0 : i32
    return %c0_i32, %c0_i32_0 : i32, i32
  }
  func.func @transform_4(%arg0: i32, %arg1: memref<2xf32, #tpu.memory_space<smem>>) -> (i32, i32) {
    %c0_i32 = arith.constant 0 : i32
    %c0_i32_0 = arith.constant 0 : i32
    %c0_i32_1 = arith.constant 0 : i32
    return %c0_i32, %c0_i32_0 : i32, i32
  }
  func.func @transform_5(%arg0: i32, %arg1: memref<2xf32, #tpu.memory_space<smem>>) -> (i32, i32) {
    %c0_i32 = arith.constant 0 : i32
    %c0_i32_0 = arith.constant 0 : i32
    %c0_i32_1 = arith.constant 0 : i32
    return %c0_i32, %c0_i32_0 : i32, i32
  }
  func.func @transform_6(%arg0: i32, %arg1: memref<2xf32, #tpu.memory_space<smem>>) -> (i32, i32) {
    %c0_i32 = arith.constant 0 : i32
    %c0_i32_0 = arith.constant 0 : i32
    %c0_i32_1 = arith.constant 0 : i32
    return %c0_i32, %c0_i32_0 : i32, i32
  }
  func.func @transform_7(%arg0: i32, %arg1: memref<2xf32, #tpu.memory_space<smem>>) -> (i32, i32) {
    %c0_i32 = arith.constant 0 : i32
    %c0_i32_0 = arith.constant 0 : i32
    return %arg0, %c0_i32 : i32, i32
  }
}

</mosaic_0001>

<bundles_post_ra>
// kernel: tpu_custom_call.1
= control target key start
LH: loop header
LB: loop body
LE: loop exit
PB: predicated region body
PF: predicated region fallthrough
CT: control target
= control target key end

     0   :  { %s273_s30 = smov [#allocation3]   ;;  %s372_s0 = inlined_call_operand.vmem [shape: f32[2], index: 0, kind: input, shape index: {}]   ;;  %s373_s1 = inlined_call_operand.hbm [shape: f32[8,16], index: 1, kind: input, shape index: {}]   ;;  %s374_s2 = inlined_call_operand.hbm [shape: f32[16,32], index: 2, kind: input, shape index: {}]   ;;  %s375_s3 = inlined_call_operand.vmem [shape: f32[1,32], index: 3, kind: input, shape index: {}]   ;;  %s376_s4 = inlined_call_operand.vmem [shape: f32[32,32], index: 4, kind: input, shape index: {}]   ;;  %s377_s5 = inlined_call_operand.vmem [shape: f32[1,32], index: 5, kind: input, shape index: {}]   ;;  %s378_s6 = inlined_call_operand.vmem [shape: f32[32,4], index: 6, kind: input, shape index: {}]   ;;  %s379_s7 = inlined_call_operand.vmem [shape: f32[1,4], index: 7, kind: input, shape index: {}]   ;;  %s380_s8 = inlined_call_operand.vmem [shape: f32[8,4], index: 8, kind: output, shape index: {}]  }
   0x1   :  { %s14_s29 = sshll.u32 %s372_s0, 4  ;;  %s15_s29 = int_to_ptr.vmem [resolvable:$true] %s14_s29 }
   0x2   :  { %17 = dma.vmem_to_smem %s15_s29, 16, %s273_s30, [#allocation2] }
   0x3   :  { %267 = dma.done.wait [#allocation2], 16 }
   0x4   :  { %268 = vsyncadd [#allocation2], 4294967280 }
   0x5   :  { %20 = sfence }
   0x6   :  { %21 = vsyncpa [#allocation5], 0  ;;  %s28_s11 = sshll.u32 %s373_s1, 4  ;;  %s29_s11 = int_to_ptr.hbm [resolvable:$true] %s28_s11 }
   0x7   :  { %22 = vsyncpa [#allocation7], 0  ;;  %s274_s12 = smov [#allocation4]   ;;  %s38_s0 = sshll.u32 %s374_s2, 4  ;;  %s39_s0 = int_to_ptr.hbm [resolvable:$true] %s38_s0 }
   0x8   :  { %s30_s13 = sshll.u32 %s274_s12, 4  ;;  %s275_s16 = smov [#allocation6]   ;;  %s31_s13 = int_to_ptr.vmem [resolvable:$true] %s30_s13 }
   0x9   :  { %33 = dma.hbm_to_vmem [thread:$0]  %s29_s11, 128, %s31_s13, [#allocation5]  }
   0xa   :  { %s40_s17 = sshll.u32 %s275_s16, 4  ;;  %s276_s18 = smov 128   ;;  %s41_s17 = int_to_ptr.vmem [resolvable:$true] %s40_s17 }
   0xb   :  { %s277_s19 = smov 8  }
   0xc   :  { %46 = dma.hbm_to_vmem [thread:$0]  %s39_s0, 256, %s41_s17, [#allocation7], %s276_s18, %s276_s18, %s277_s19  }
   0xd   :  { %269 = dma.done.wait [#allocation5], 128  }
   0xe   :  { %270 = vsyncadd [#allocation5], 4294967168 }
   0xf   :  { %271 = dma.done.wait [#allocation7], 256  }
  0x10   :  { %272 = vsyncadd [#allocation7], 4294967040  ;;  %v65_v0 = vld [vmem:[#allocation4] sm:$0xff]  ;;  %vm67_vm0 = vcmask 130048   ;;  %v86_v3 = vld [vmem:[#allocation6 + $0x8] sm:$0xff]  ;;  %s83_s28 = sld [smem:[#allocation3]] }
  0x11   :  { %v66_v1 = vmul.f32 %v65_v0, %v65_v0  ;;  %v85_v4 = vld [vmem:[#allocation6] sm:$0xff]  ;;  %108 = vmatpush.msra.mxu0 %v86_v3  ;;  %v121_v5 = vld [vmem:[%s376_s4 + $0x18] sm:$0xff]  ;;  %v120_v16 = vld [vmem:[%s376_s4 + $0x10] sm:$0xff]  ;;  %vm126_vm5 = vcmask 261120   ;;  %s193_s13 = sld [smem:[#allocation3 + $0x1]]  ;;  %vm185_vm7 = vcmask 31744  }
  0x12   :  { %142 = vmatpush.msra.mxu1 %v121_v5  ;;  %v119_v17 = vld [vmem:[%s376_s4 + $0x8] sm:$0xff]  ;;  %v118_v18 = vld [vmem:[%s376_s4] sm:$0xff]  ;;  %v157_v19 = vld [vmem:[%s378_s6 + $0x18] sm:$0xff] }
  0x13   :  { %v68_v2 = vsel %vm67_vm0, %v66_v1, 0.0  ;;  %109 = vmatpush.msra.mxu0 %v85_v4  ;;  %177 = vmatpush.msra.mxu2 %v157_v19  ;;  %v202_v20 = vld [vmem:[%s375_s3] ss:$0 sm:$0xff]  ;;  %v156_v26 = vld [vmem:[%s378_s6 + $0x10] sm:$0xff]  ;;  %v155_v27 = vld [vmem:[%s378_s6 + $0x8] sm:$0xff] }
  0x14   :  { %69 = vadd.xlane.f32.xlu0 %v68_v2  ;;  %143 = vmatpush.msra.mxu1 %v120_v16  ;;  %v154_v28 = vld [vmem:[%s378_s6] sm:$0xff] }
  0x15   :  { %178 = vmatpush.msra.mxu2 %v156_v26  ;;  %v203_v29 = vld [vmem:[%s377_s5] ss:$0 sm:$0xff] }
  0x16   :  { %144 = vmatpush.msra.mxu1 %v119_v17  ;;  %v115_v22 = vstv %s83_s28  ;;  %v204_v35 = vld [vmem:[%s379_s7] ss:$0 sm:$0xff] }
  0x17   :  { %179 = vmatpush.msra.mxu2 %v155_v27  ;;  %v151_v31 = vstv %s193_s13 }
  0x18   :  { %145 = vmatpush.msra.mxu1 %v118_v18 }
  0x19   :  { %180 = vmatpush.msra.mxu2 %v154_v28 }
  0x87   :  { %v70_v6 = vpop.xlane.xlu0 %69 }
  0x88   :  { %v71_v7 = vmax.f32 %v70_v6, 1e-24 }
  0x8a   :  { %205 = vrsqrt.f32 %v71_v7  ;;  %vm78_vm2 = vweird.f32 %v71_v7 }
  0x90   :  { %v206_v8 = vpop.eup %205 }
  0x91   :  { %v73_v9 = vmul.f32 %v206_v8, %v71_v7  ;;  %vm79_vm1 = vweird.f32 %v206_v8 }
  0x92   :  { %vm80_vm3 = vmor %vm78_vm2, %vm79_vm1 }
  0x93   :  { %v74_v10 = vmul.f32 %v206_v8, %v73_v9 }
  0x95   :  { %v75_v11 = vmul.f32 0.5, %v74_v10 }
  0x97   :  { %v76_v12 = vsub.f32 1.5, %v75_v11 }
  0x99   :  { %v77_v13 = vmul.f32 %v206_v8, %v76_v12 }
  0x9b   :  { %v81_v14 = vsel %vm80_vm3, %v206_v8, %v77_v13 }
  0x9c   :  { %v82_v15 = vmul.f32 %v81_v14, %v65_v0 }
  0x9e   :  { %194 = vmatmul.msk.f32.vlgmr.msra.gmra.mxu0 %vm67_vm0, %v82_v15 }
 0x11b   :  { %v111_v21 = vpop.f32.mrf.mxu0 }
 0x11c   :  { %v112_v23 = vadd.f32 %v202_v20, %v111_v21 }
 0x11e   :  { %v116_v24 = vmul.f32 %v115_v22, %v112_v23  ;;  %vm114_vm4 = vcmp.ge.f32.partialorder %v112_v23, 0.0 }
 0x120   :  { %v117_v25 = vsel %vm114_vm4, %v112_v23, %v116_v24 }
 0x121   :  { %195 = vmatmul.msk.f32.vlgmr.msra.gmra.mxu1 %vm126_vm5, %v117_v25 }
 0x19e   :  { %v147_v30 = vpop.f32.mrf.mxu1 }
 0x19f   :  { %v148_v32 = vadd.f32 %v203_v29, %v147_v30 }
 0x1a1   :  { %v152_v33 = vmul.f32 %v151_v31, %v148_v32  ;;  %vm150_vm6 = vcmp.ge.f32.partialorder %v148_v32, 0.0 }
 0x1a3   :  { %v153_v34 = vsel %vm150_vm6, %v148_v32, %v152_v33 }
 0x1a4   :  { %196 = vmatmul.msk.f32.vlgmr.msra.gmra.mxu2 %vm126_vm5, %v153_v34 }
 0x227   :  { %v182_v36 = vpop.f32.mrf.mxu2 }
 0x228   :  { %v183_v37 = vadd.f32 %v204_v35, %v182_v36 }
 0x22a   :  { %186 = vst.msk [vmem:[%s380_s8] sm:$0xff] %vm185_vm7, %v183_v37 }
 0x22b   :  { %191 = vsyncpa [#allocation5], 1 }
 0x22c   :  { %192 = vsyncpa [#allocation7], 1 }

</bundles_post_ra>
